<compile_context>
chip_gen: v7x
topology: tpu7x:2x2x1
jax: 0.10.0
libtpu: 0.0.40
codegen_flags: <defaults>
</compile_context>

<pallas_src>
from functools import partial

import jax
import jax.numpy as jnp
from jax.experimental import pallas as pl
from jax.experimental.pallas import tpu as pltpu


def _ce2d_kernel(logits_ref, target_ref, loss_ref, cnt_ref, *,
                 ignore_label, hw, tile):
    j = pl.program_id(1)

    # Per-batch accumulators live in the output blocks (same block index for
    # every spatial tile j) — zero them on the first tile of each batch.
    @pl.when(j == 0)
    def _():
        loss_ref[...] = jnp.zeros_like(loss_ref)
        cnt_ref[...] = jnp.zeros_like(cnt_ref)

    logits = logits_ref[...].astype(jnp.float32)        # (C, T)  classes x pixels
    tgt = target_ref[...]                               # (1, T)  int32

    # Validity: in-bounds pixel (ragged, un-padded hw axis) AND a real label.
    lane = jax.lax.broadcasted_iota(jnp.int32, tgt.shape, 1)        # (1, T)
    in_bounds = (j * tile + lane) < hw
    valid = in_bounds & (tgt >= 0) & (tgt != ignore_label)          # (1, T) bool

    # Numerically-stable log-sum-exp over the class (sublane) axis.
    m = jnp.max(logits, axis=0, keepdims=True)                      # (1, T)
    lse = m + jnp.log(jnp.sum(jnp.exp(logits - m), axis=0, keepdims=True))

    # Fused one-hot gather of the target-class logit (no gather, no f32 one-hot temp).
    class_iota = jax.lax.broadcasted_iota(jnp.int32, logits.shape, 0)
    tgt_logit = jnp.sum(jnp.where(class_iota == tgt, logits, 0.0),
                        axis=0, keepdims=True)                      # (1, T)

    # NaN-safe selection: garbage lanes from the out-of-bounds tail are selected
    # away (never multiplied), so no pad of the logits is needed upstream.
    loss_ref[...] += jnp.where(valid, lse - tgt_logit, 0.0)
    cnt_ref[...] += jnp.where(valid, 1.0, 0.0)


def _pick_tile(hw, c, dtype_bytes, *, budget_bytes=6 * 1024 * 1024,
               max_tile=32768):
    """Largest lane tile (multiple of 128) whose double-buffered blocks fit the budget."""
    # 2x logits blocks + 2x int32 target blocks + 2x resident f32 output accumulators
    per_pixel = 2 * c * dtype_bytes + 2 * 4 + 2 * 2 * 4
    tile = budget_bytes // per_pixel
    tile = max(128, (tile // 128) * 128)
    tile = min(tile, max_tile)
    tile = min(tile, pl.cdiv(hw, 128) * 128)   # never wider than (rounded-up) hw
    return int(tile)


def cross_entropy_2d(predict, target, weight=None, *, size_average=True,
                     ignore_label=255):
    """Pallas equivalent of CrossEntropy2d.forward (weight=None supported).

    `predict` may be float32 or bfloat16; bf16 halves HBM bytes read and the
    log-sum-exp math is still done in f32 inside the kernel.
    """
    assert weight is None  # TODO(synk): per-class `weight` rescaling not implemented.
    n, c, h, w = predict.shape
    assert target.shape == (n, h, w)
    hw = h * w

    tile = _pick_tile(hw, c, jnp.dtype(predict.dtype).itemsize)
    num_tiles = pl.cdiv(hw, tile)

    logits = predict.reshape(n, c, hw)                  # free reshape, native NCHW layout
    tgt = target.reshape(n, 1, hw).astype(jnp.int32)    # lane-dense labels (no pad)

    loss_part, cnt_part = pl.pallas_call(
        partial(_ce2d_kernel, ignore_label=ignore_label, hw=hw, tile=tile),
        out_shape=(jax.ShapeDtypeStruct((n, 1, tile), jnp.float32),
                   jax.ShapeDtypeStruct((n, 1, tile), jnp.float32)),
        grid=(n, num_tiles),
        in_specs=[
            pl.BlockSpec((None, c, tile), lambda b, j: (b, 0, j)),
            pl.BlockSpec((None, 1, tile), lambda b, j: (b, 0, j)),
        ],
        out_specs=(
            pl.BlockSpec((None, 1, tile), lambda b, j: (b, 0, 0)),
            pl.BlockSpec((None, 1, tile), lambda b, j: (b, 0, 0)),
        ),
        compiler_params=pltpu.CompilerParams(
            # Batch axis shards across v7x's two TensorCores; per-batch partial
            # outputs keep that race-free.  Spatial axis carries the resident
            # accumulator, so it stays "arbitrary".
            dimension_semantics=("parallel", "arbitrary"),
            # Explicit limit: above v5e's 16 MiB scoped default, well under
            # v7x's 64 MiB physical VMEM.
            vmem_limit_bytes=32 * 1024 * 1024,
        ),
    )(logits, tgt)

    total = jnp.sum(loss_part)                 # tiny (n, 1, tile) partials
    count = jnp.sum(cnt_part)
    loss = total / jnp.maximum(count, 1.0) if size_average else total
    # PyTorch module returns 0 when there are no valid pixels.
    return jnp.where(count > 0, loss, jnp.float32(0.0))


if __name__ == "__main__":
    key = jax.random.PRNGKey(0)
    k1, k2 = jax.random.split(key)

    n, c, h, w = 2, 4, 16, 16
    ignore_label = 255

    predict = jax.random.normal(k1, (n, c, h, w), dtype=jnp.float32)
    target = jax.random.randint(k2, (n, h, w), 0, c, dtype=jnp.int32)
    # sprinkle in some ignored pixels
    ignore_mask = jax.random.bernoulli(jax.random.PRNGKey(42), 0.2, (n, h, w))
    target = jnp.where(ignore_mask, ignore_label, target)

    loss = cross_entropy_2d(predict, target, ignore_label=ignore_label,
                            size_average=True)
    loss = jax.block_until_ready(loss)

    # pure-JAX reference check
    logits = jnp.transpose(predict, (0, 2, 3, 1)).reshape(-1, c)
    tgt = target.reshape(-1)
    valid = (tgt >= 0) & (tgt != ignore_label)
    logp = jax.nn.log_softmax(logits, axis=-1)
    nll = -jnp.take_along_axis(logp, jnp.clip(tgt, 0, c - 1)[:, None],
                               axis=-1)[:, 0]
    ref = jnp.sum(jnp.where(valid, nll, 0.0)) / jnp.sum(valid)
    assert jnp.allclose(loss, ref, atol=1e-5, rtol=1e-5), (loss, ref)

    print("KERNEL_OK")
</pallas_src>

<mosaic_0001>
module attributes {stable_mosaic.version = 11 : i64} {
  func.func @_ce2d_kernel(%arg0: i32, %arg1: i32, %arg2: memref<1x4x256xf32, #tpu.memory_space<vmem>>, %arg3: memref<1x1x256xi32, #tpu.memory_space<vmem>>, %arg4: memref<1x1x256xf32, #tpu.memory_space<vmem>>, %arg5: memref<1x1x256xf32, #tpu.memory_space<vmem>>) attributes {dimension_semantics = [#tpu.dimension_semantics<parallel>, #tpu.dimension_semantics<arbitrary>], iteration_bounds = array<i64: 2, 1>, scalar_prefetch = 0 : i64, scratch_operands = 0 : i64, tpu.core_type = #tpu.core_type<tc>, window_params = [{transform_indices = @transform_0, window_bounds = array<i64: 1, 4, 256>}, {transform_indices = @transform_1, window_bounds = array<i64: 1, 1, 256>}, {transform_indices = @transform_2, window_bounds = array<i64: 1, 1, 256>}, {transform_indices = @transform_3, window_bounds = array<i64: 1, 1, 256>}]} {
    %c0_i32 = arith.constant 0 : i32
    %0 = arith.cmpi eq, %arg1, %c0_i32 : i32
    %1 = arith.extui %0 : i1 to i32
    %c0_i32_0 = arith.constant 0 : i32
    %2 = arith.cmpi ne, %1, %c0_i32_0 : i32
    scf.if %2 {
      %cst_26 = arith.constant 0.000000e+00 : f32
      %53 = vector.broadcast %cst_26 : f32 to vector<1x256xf32>
      %c0_27 = arith.constant 0 : index
      %c0_28 = arith.constant 0 : index
      %c0_29 = arith.constant 0 : index
      %54 = vector.load %arg4[%c0_27, %c0_28, %c0_29] : memref<1x1x256xf32, #tpu.memory_space<vmem>>, vector<1x1x256xf32>
      %55 = vector.shape_cast %54 : vector<1x1x256xf32> to vector<1x256xf32>
      %56 = vector.shape_cast %53 : vector<1x256xf32> to vector<1x1x256xf32>
      tpu.vector_store %arg4[%c0_27, %c0_28, %c0_29], %56 {strides = array<i32>} : memref<1x1x256xf32, #tpu.memory_space<vmem>>, vector<1x1x256xf32>,
      %cst_30 = arith.constant 0.000000e+00 : f32
      %57 = vector.broadcast %cst_30 : f32 to vector<1x256xf32>
      %c0_31 = arith.constant 0 : index
      %c0_32 = arith.constant 0 : index
      %c0_33 = arith.constant 0 : index
      %58 = vector.load %arg5[%c0_31, %c0_32, %c0_33] : memref<1x1x256xf32, #tpu.memory_space<vmem>>, vector<1x1x256xf32>
      %59 = vector.shape_cast %58 : vector<1x1x256xf32> to vector<1x256xf32>
      %60 = vector.shape_cast %57 : vector<1x256xf32> to vector<1x1x256xf32>
      tpu.vector_store %arg5[%c0_31, %c0_32, %c0_33], %60 {strides = array<i32>} : memref<1x1x256xf32, #tpu.memory_space<vmem>>, vector<1x1x256xf32>,
    } else {
    }
    %c0 = arith.constant 0 : index
    %c0_1 = arith.constant 0 : index
    %c0_2 = arith.constant 0 : index
    %3 = vector.load %arg2[%c0, %c0_1, %c0_2] : memref<1x4x256xf32, #tpu.memory_space<vmem>>, vector<1x4x256xf32>
    %4 = vector.shape_cast %3 : vector<1x4x256xf32> to vector<4x256xf32>
    %c0_3 = arith.constant 0 : index
    %c0_4 = arith.constant 0 : index
    %c0_5 = arith.constant 0 : index
    %5 = vector.load %arg3[%c0_3, %c0_4, %c0_5] : memref<1x1x256xi32, #tpu.memory_space<vmem>>, vector<1x1x256xi32>
    %6 = vector.shape_cast %5 : vector<1x1x256xi32> to vector<1x256xi32>
    %7 = tpu.iota {dimensions = array<i32: 1>} : vector<1x256xi32>
    %c256_i32 = arith.constant 256 : i32
    %8 = arith.muli %arg1, %c256_i32 : i32
    %9 = vector.broadcast %8 : i32 to vector<1x256xi32>
    %10 = arith.addi %9, %7 : vector<1x256xi32>
    %c256_i32_6 = arith.constant 256 : i32
    %11 = vector.broadcast %c256_i32_6 : i32 to vector<1x256xi32>
    %12 = arith.cmpi slt, %10, %11 : vector<1x256xi32>
    %c0_i32_7 = arith.constant 0 : i32
    %13 = vector.broadcast %c0_i32_7 : i32 to vector<1x256xi32>
    %14 = arith.cmpi sge, %6, %13 : vector<1x256xi32>
    %15 = arith.andi %12, %14 : vector<1x256xi1>
    %c255_i32 = arith.constant 255 : i32
    %16 = vector.broadcast %c255_i32 : i32 to vector<1x256xi32>
    %17 = arith.cmpi ne, %6, %16 : vector<1x256xi32>
    %18 = arith.andi %15, %17 : vector<1x256xi1>
    %cst = arith.constant dense<0xFF800000> : vector<256xf32>
    %19 = vector.multi_reduction <maximumf>, %4, %cst [0] : vector<4x256xf32> to vector<256xf32>
    %20 = vector.shape_cast %19 : vector<256xf32> to vector<1x256xf32>
    %21 = vector.broadcast %20 : vector<1x256xf32> to vector<4x256xf32>
    %22 = arith.subf %4, %21 : vector<4x256xf32>
    %23 = math.exp %22 : vector<4x256xf32>
    %cst_8 = arith.constant dense<0.000000e+00> : vector<256xf32>
    %24 = vector.multi_reduction <add>, %23, %cst_8 [0] : vector<4x256xf32> to vector<256xf32>
    %25 = vector.shape_cast %24 : vector<256xf32> to vector<1x256xf32>
    %26 = math.log %25 : vector<1x256xf32>
    %27 = arith.addf %20, %26 : vector<1x256xf32>
    %28 = tpu.iota {dimensions = array<i32: 0>} : vector<4x256xi32>
    %29 = vector.broadcast %6 : vector<1x256xi32> to vector<4x256xi32>
    %30 = arith.cmpi eq, %28, %29 : vector<4x256xi32>
    %cst_9 = arith.constant 0.000000e+00 : f32
    %31 = vector.broadcast %cst_9 : f32 to vector<4x256xf32>
    %32 = arith.select %30, %4, %31 : vector<4x256xi1>, vector<4x256xf32>
    %cst_10 = arith.constant dense<0.000000e+00> : vector<256xf32>
    %33 = vector.multi_reduction <add>, %32, %cst_10 [0] : vector<4x256xf32> to vector<256xf32>
    %34 = vector.shape_cast %33 : vector<256xf32> to vector<1x256xf32>
    %c0_11 = arith.constant 0 : index
    %c0_12 = arith.constant 0 : index
    %c0_13 = arith.constant 0 : index
    %35 = vector.load %arg4[%c0_11, %c0_12, %c0_13] : memref<1x1x256xf32, #tpu.memory_space<vmem>>, vector<1x1x256xf32>
    %36 = vector.shape_cast %35 : vector<1x1x256xf32> to vector<1x256xf32>
    %37 = arith.subf %27, %34 : vector<1x256xf32>
    %cst_14 = arith.constant 0.000000e+00 : f32
    %38 = vector.broadcast %cst_14 : f32 to vector<1x256xf32>
    %39 = arith.select %18, %37, %38 : vector<1x256xi1>, vector<1x256xf32>
    %40 = arith.addf %36, %39 : vector<1x256xf32>
    %c0_15 = arith.constant 0 : index
    %c0_16 = arith.constant 0 : index
    %c0_17 = arith.constant 0 : index
    %41 = vector.load %arg4[%c0_15, %c0_16, %c0_17] : memref<1x1x256xf32, #tpu.memory_space<vmem>>, vector<1x1x256xf32>
    %42 = vector.shape_cast %41 : vector<1x1x256xf32> to vector<1x256xf32>
    %43 = vector.shape_cast %40 : vector<1x256xf32> to vector<1x1x256xf32>
    tpu.vector_store %arg4[%c0_15, %c0_16, %c0_17], %43 {strides = array<i32>} : memref<1x1x256xf32, #tpu.memory_space<vmem>>, vector<1x1x256xf32>,
    %c0_18 = arith.constant 0 : index
    %c0_19 = arith.constant 0 : index
    %c0_20 = arith.constant 0 : index
    %44 = vector.load %arg5[%c0_18, %c0_19, %c0_20] : memref<1x1x256xf32, #tpu.memory_space<vmem>>, vector<1x1x256xf32>
    %45 = vector.shape_cast %44 : vector<1x1x256xf32> to vector<1x256xf32>
    %cst_21 = arith.constant 1.000000e+00 : f32
    %cst_22 = arith.constant 0.000000e+00 : f32
    %46 = vector.broadcast %cst_21 : f32 to vector<1x256xf32>
    %47 = vector.broadcast %cst_22 : f32 to vector<1x256xf32>
    %48 = arith.select %18, %46, %47 : vector<1x256xi1>, vector<1x256xf32>
    %49 = arith.addf %45, %48 : vector<1x256xf32>
    %c0_23 = arith.constant 0 : index
    %c0_24 = arith.constant 0 : index
    %c0_25 = arith.constant 0 : index
    %50 = vector.load %arg5[%c0_23, %c0_24, %c0_25] : memref<1x1x256xf32, #tpu.memory_space<vmem>>, vector<1x1x256xf32>
    %51 = vector.shape_cast %50 : vector<1x1x256xf32> to vector<1x256xf32>
    %52 = vector.shape_cast %49 : vector<1x256xf32> to vector<1x1x256xf32>
    tpu.vector_store %arg5[%c0_23, %c0_24, %c0_25], %52 {strides = array<i32>} : memref<1x1x256xf32, #tpu.memory_space<vmem>>, vector<1x1x256xf32>,
    return
  }
  func.func @transform_0(%arg0: i32, %arg1: i32) -> (i32, i32, i32) {
    %c0_i32 = arith.constant 0 : i32
    %c0_i32_0 = arith.constant 0 : i32
    return %arg0, %c0_i32, %arg1 : i32, i32, i32
  }
  func.func @transform_1(%arg0: i32, %arg1: i32) -> (i32, i32, i32) {
    %c0_i32 = arith.constant 0 : i32
    %c0_i32_0 = arith.constant 0 : i32
    return %arg0, %c0_i32, %arg1 : i32, i32, i32
  }
  func.func @transform_2(%arg0: i32, %arg1: i32) -> (i32, i32, i32) {
    %c0_i32 = arith.constant 0 : i32
    %c0_i32_0 = arith.constant 0 : i32
    %c0_i32_1 = arith.constant 0 : i32
    return %arg0, %c0_i32, %c0_i32_0 : i32, i32, i32
  }
  func.func @transform_3(%arg0: i32, %arg1: i32) -> (i32, i32, i32) {
    %c0_i32 = arith.constant 0 : i32
    %c0_i32_0 = arith.constant 0 : i32
    %c0_i32_1 = arith.constant 0 : i32
    return %arg0, %c0_i32, %c0_i32_0 : i32, i32, i32
  }
}

</mosaic_0001>

<bundles_post_ra>
// kernel: tpu_custom_call.1
= control target key start
LH: loop header
LB: loop body
LE: loop exit
PB: predicated region body
PF: predicated region fallthrough
CT: control target
= control target key end

     0   :  { %9 = vsyncpa [#allocation3], 0  ;;  %s1294_s0 = inlined_call_operand.hbm [shape: f32[2,4,256], index: 0, kind: input, shape index: {}]   ;;  %s1295_s1 = inlined_call_operand.hbm [shape: s32[2,1,256], index: 1, kind: input, shape index: {}]   ;;  %s1296_s2 = inlined_call_operand.hbm [shape: f32[2,1,256], index: 2, kind: output, shape index: {0}]   ;;  %s1297_s3 = inlined_call_operand.hbm [shape: f32[2,1,256], index: 3, kind: output, shape index: {1}]  }
   0x1   :  { %11 = vsyncpa [#allocation3 + $0x1], 0 }
   0x2   :  { %12 = vsyncpa [#allocation6], 0 }
   0x3   :  { %14 = vsyncpa [#allocation6 + $0x1], 0 }
   0x4   :  { %15 = vsyncpa [#allocation4], 0 }
   0x5   :  { %17 = vsyncpa [#allocation4 + $0x1], 0 }
   0x6   :  { %18 = vsyncpa [#allocation9], 0 }
   0x7   :  { %20 = vsyncpa [#allocation9 + $0x1], 0  ;;  %s924_s12 = smov 0   ;;  %s926_s13 = smov 0  }
   0x8   :  { %s928_s14 = smov 0   ;;  %s930_s15 = smov 0  }
   0x9   :  { %s932_s16 = smov 0   ;;  %s934_s17 = smov 0  }
   0xa LB: > { %s608_s18 = sadd.s32 4294967295, %s895_s17   ;;  %s609_s19 = sadd.s32 4294967294, %s895_s17   ;;  %s895_s17 = sphi %s934_s17, %s26_s17   ;;  %s891_s16 = sphi %s932_s16, %s1327_s16   ;;  %s887_s15 = sphi %s930_s15, %s1326_s15   ;;  %s883_s14 = sphi %s928_s14, %s1325_s14   ;;  %s879_s13 = sphi %s926_s13, %s1324_s13   ;;  %s875_s12 = sphi %s924_s12, %s1323_s12  }
   0xb   : > { %s38_s20 = sadd.s32 1, %s891_s16  ;;  %s47_s21 = sadd.s32 1, %s883_s14 }
   0xc   : > { %p40_p0 = scmp.ge.s32.totalorder %s38_s20, 2  ;;  %p54_p1 = scmp.ne.s32.totalorder %s883_s14, %s879_s13 }
   0xd   : > { %p55_p2 = scmp.eq.s32.totalorder %s895_s17, 0  ;;  %p60_p3 = scmp.ne.s32.totalorder %s879_s13, %s875_s12 }
   0xe   : > { %s1329_s20 = smov (%p40_p0, %s38_s20), 0  ;;  %p61_p5 = scmp.eq.s32.totalorder %s608_s18, 0 }
   0xf   : > { %p965_p4 = por %p55_p2, %p54_p1  ;;  %s42_s23 = ssub.s32 %s891_s16, %s1329_s20 }
  0x10   : > { %p112_p6 = scmp.eq.s32.totalorder %s608_s18, 1  ;;  %p45_p7 = scmp.eq.s32.totalorder %s42_s23, 0 }
  0x11   : > { %p971_p8 = por %p61_p5, %p60_p3  ;;  %p118_p10 = scmp.eq.s32.totalorder %s609_s19, 1 }
  0x12   : > { %p975_p9 = por %p112_p6, %p54_p1  ;;  %p657_p13 = scmp.lt.s32.totalorder %s895_s17, 2 }
  0x13   : > { %s1301_s24 = scalar_select %p971_p8, 1, 0 }
  0x14   : > { %s1302_s25 = scalar_select %p975_p9, 1, 0 }
  0x15   : > { %s980_s26 = scalar_select %p45_p7, %s883_s14, %s47_s21  }
  0x16   : > { %p982_p11 = por %p118_p10, %p60_p3  ;;  %s989_s28 = sand.u32 1, %s883_s14  }
  0x17   : > { %s612_s29 = sshll.u32 %s989_s28, 3  ;;  %s631_s30 = sshll.u32 %s891_s16, 7 }
  0x18   : > { %s1303_s27 = scalar_select %p982_p11, 1, 0 }
  0x19   : > { %s996_s6 = scalar_lea.hbm %s1294_s0, %s631_s30  ;;  %s168_s7 = scalar_lea.vmem [#allocation2], %s612_s29 }
  0x1a   : > { %s178_s8 = sshll.u32 %s168_s7, 4  ;;  %p1002_p0 = pnand %p657_p13, %p965_p4  ;;  %s998_s8 = int_to_ptr.vmem [resolvable:$true] %s178_s8 }
  0x1b   : > { %s165_s10 = scalar_lea.sflag [#allocation3], %s989_s28  ;;  %s717_s11 = scalar_lea.hbm %s996_s6, 128 }
  0x1c   : > { %p718_p3 = scmp.ne.s32.totalorder %s996_s6, %s717_s11  ;;  %p719_p5 = pneg %p1002_p0 }
  0x1d   : > { %s722_s21 = scalar_lea.hbm %s1294_s0, 256  ;;  %p723_p4 = scmp.lt.u32.totalorder %s996_s6, %s1294_s0 }
  0x1e   : > { %p720_p6 = pnand %p719_p5, %p718_p3  ;;  %p724_p10 = scmp.lt.u32.totalorder %s722_s21, %s717_s11 }
  0x1f   : > { %p726_p12 = scmp.lt.u32.totalorder %s717_s11, %s996_s6 }
  0x20   : > { %p721_p7 = pneg %p720_p6  ;;  %p725_p13 = por %p724_p10, %p723_p4 }
  0x22   : > { %p727_p1 = por %p726_p12, %p725_p13 }
  0x24   : > { %p728_p2 = pnand %p727_p1, %p721_p7 }
  0x26   : > { %731 = shalt.err (!%p728_p2)
}
  0x27   : > { %s732_s29 = scalar_lea.vmem %s998_s8, 128  ;;  %s897_s30 = smov [#allocation2]  }
  0x28   : > { %p733_p3 = scmp.ne.s32.totalorder %s998_s8, %s732_s29  ;;  %s737_s4 = sshll.u32 %s897_s30, 4  ;;  %s738_s4 = int_to_ptr.vmem [resolvable:$false] %s737_s4 }
  0x29   : > { %s739_s5 = scalar_lea.vmem %s738_s4, 256  ;;  %p740_p9 = scmp.lt.s32.totalorder %s998_s8, %s738_s4 }
  0x2a   : > { %p735_p6 = pnand %p733_p3, %p719_p5  ;;  %p741_p4 = scmp.lt.s32.totalorder %s739_s5, %s732_s29 }
  0x2c   : > { %p736_p11 = pneg %p735_p6  ;;  %p742_p10 = por %p741_p4, %p740_p9 }
  0x2e   : > { %p743_p12 = pnand %p742_p10, %p736_p11 }
  0x30   : > { %746 = shalt.err (!%p743_p12)
}
  0x31   : > { %646 = dma.hbm_to_vmem [thread:$0]  (!%p1002_p0), %s996_s6, 128, %s998_s8, %s165_s10  }
  0x32   : > { %p1305_p1 = scmp.lt.s32.totalorder %s895_s17, 3  ;;  %p1306_p2 = scmp.ge.s32.totalorder %s895_s17, 1 }
  0x33   : > { %s615_s11 = sshll.u32 %s989_s28, 1  ;;  %s632_s18 = sshll.u32 %s891_s16, 5 }
  0x34   : > { %p1038_p7 = pnand %p1306_p2, %p1305_p1  ;;  %s1047_s22 = scalar_lea.hbm %s1295_s1, %s632_s18 }
  0x35   : > { %s189_s23 = scalar_lea.vmem [#allocation5], %s615_s11  ;;  %s186_s6 = scalar_lea.sflag [#allocation6], %s989_s28 }
  0x36   : > { %s1307_s7 = scalar_select %p1038_p7, 1, 0 }
  0x37   : > { %s199_s29 = sshll.u32 %s189_s23, 4  ;;  %s747_s8 = scalar_lea.hbm %s1047_s22, 32  ;;  %s200_s29 = int_to_ptr.vmem [resolvable:$true] %s199_s29 }
  0x38   : > { %p748_p9 = scmp.ne.s32.totalorder %s1047_s22, %s747_s8  ;;  %s752_s4 = scalar_lea.hbm %s1295_s1, 64 }
  0x39   : > { %p753_p3 = scmp.lt.u32.totalorder %s1047_s22, %s1295_s1  ;;  %p754_p6 = scmp.lt.u32.totalorder %s752_s4, %s747_s8 }
  0x3a   : > { %p750_p11 = pnand %p748_p9, %p719_p5  ;;  %p756_p10 = scmp.lt.u32.totalorder %s747_s8, %s1047_s22 }
  0x3b   : > { %p755_p4 = por %p754_p6, %p753_p3 }
  0x3c   : > { %p751_p13 = pneg %p750_p11 }
  0x3d   : > { %p757_p12 = por %p756_p10, %p755_p4 }
  0x3f   : > { %p758_p1 = pnand %p757_p12, %p751_p13 }
  0x41   : > { %761 = shalt.err (!%p758_p1)
}
  0x42   : > { %s762_s28 = scalar_lea.vmem %s200_s29, 32  ;;  %s898_s11 = smov [#allocation5]  }
  0x43   : > { %p763_p2 = scmp.ne.s32.totalorder %s200_s29, %s762_s28  ;;  %s767_s19 = sshll.u32 %s898_s11, 4  ;;  %s768_s19 = int_to_ptr.vmem [resolvable:$false] %s767_s19 }
  0x44   : > { %s769_s21 = scalar_lea.vmem %s768_s19, 64  ;;  %p770_p8 = scmp.lt.s32.totalorder %s200_s29, %s768_s19 }
  0x45   : > { %p765_p9 = pnand %p763_p2, %p719_p5  ;;  %p771_p7 = scmp.lt.s32.totalorder %s769_s21, %s762_s28 }
  0x47   : > { %p766_p11 = pneg %p765_p9  ;;  %p772_p3 = por %p771_p7, %p770_p8 }
  0x49   : > { %p773_p6 = pnand %p772_p3, %p766_p11 }
  0x4b   : > { %776 = shalt.err (!%p773_p6)
}
  0x4c   : > { %649 = dma.hbm_to_vmem [thread:$0]  (!%p1002_p0), %s1047_s22, 32, %s200_s29, %s186_s6  }
  0x4d   : > { %p1308_p13 = scmp.ne.s32.totalorder %s1307_s7, 0 }
  0x4e   : > { %s1072_s23 = sand.u32 (!%p1308_p13), 1, %s879_s13   ;;  %p1309_p5 = scmp.ne.s32.totalorder (!%p1308_p13), %s1301_s24, 0 }
  0x4f   : > { %208 = sbr.rel (%p1308_p13) target bundleno = 193 (0xc1), region = 28  ;;  %s619_s8 = sshll.u32 (!%p1308_p13), %s1072_s23, 3 }
  0x50   : > { %s211_s10 = scalar_lea.sflag (!%p1308_p13), [#allocation3], %s1072_s23  ;;  %s214_s30 = scalar_lea.vmem (!%p1308_p13), [#allocation2], %s619_s8 }
  0x56   : > { %858 = dma.done.wait (%p1309_p5), %s211_s10, 128  }
  0x57   : > { %860 = vsyncadd (%p1309_p5), %s211_s10, 4294967168  ;;  %s620_s9 = sshll.u32 %s1072_s23, 1  ;;  %s220_s7 = scalar_lea.sflag [#allocation6], %s1072_s23 }
  0x58   : > { %s223_s22 = scalar_lea.vmem [#allocation5], %s620_s9 }
  0x59   : > { %862 = dma.done.wait (%p1309_p5), %s220_s7, 32  }
  0x5a   : > { %864 = vsyncadd (%p1309_p5), %s220_s7, 4294967264  ;;  %v262_v0 = vlaneseq  ;;  %s1090_s29 = scalar_lea.vmem [#allocation7], %s620_s9  ;;  %v899_v2 = vmov 0.0   ;;  %s1097_s6 = scalar_lea.vmem [#allocation8], %s620_s9  ;;  %vm310_vm1 = vcmask 1043456   ;;  %v1102_v4 = vld [vmem:[%s214_s30] sm:$0xff] }
  0x5b   : > { %v1104_v5 = vld [vmem:[%s223_s22] sm:$0x3]  ;;  %v900_v8 = vmov 1966171168   ;;  %v1116_v10 = vcombine.high %v1102_v4, %v1102_v4  ;;  %v311_v11 = vsel %vm310_vm1, %v1102_v4, -inf  ;;  %v901_v12 = vmov 0  }
  0x5c   : > { %vm1086_vm0 = vcmp.lt.s32.totalorder %v262_v0, 256  ;;  %v1095_v3 = vshrl.u32 %v262_v0, 7  ;;  %v392_v9 = vunpack.c.l.s4 %v900_v8  ;;  %vm279_vm2 = vcmp.ge.s32.totalorder %v1104_v5, 0  ;;  %s633_s24 = sshll.u32 %s887_s15, 5  ;;  %s469_s4 = sshll.u32 %s1097_s6, 4  ;;  %s1179_s4 = int_to_ptr.vmem [resolvable:$true] %s469_s4 }
  0x5d   : > { %266 = vst.msk [vmem:[%s1090_s29] sm:$0x3] %vm1086_vm0, %v899_v2  ;;  %267 = vst.msk [vmem:[%s1097_s6] sm:$0x3] %vm1086_vm0, %v899_v2  ;;  %vm293_vm3 = vcmp.ne.s32.totalorder %v1104_v5, 255  ;;  %v280_v13 = vsel %vm279_vm2, 1, %v901_v12  ;;  %s1177_s28 = scalar_lea.hbm %s1297_s3, %s633_s24 }
  0x5e   : > { %v1107_v6 = vsub.s32 0, %v1095_v3  ;;  %v1110_v7 = vsub.s32 1, %v1095_v3  ;;  %v294_v14 = vsel %vm293_vm3, 1, %v901_v12  ;;  %v312_v15 = vrot.slane %v311_v11, 4  ;;  %s441_s11 = scalar_lea.sflag [#allocation9], %s1072_s23  ;;  %s777_s19 = scalar_lea.vmem %s1179_s4, 32 }
  0x5f   : > { %v318_v21 = vsel %vm310_vm1, %v1116_v10, -inf  ;;  %v393_v22 = vunpack.c.0.s8 %v392_v9  ;;  %p778_p8 = scmp.ne.s32.totalorder %s1179_s4, %s777_s19  ;;  %p1320_p0 = scmp.ne.s32.totalorder %s1302_s25, 0 }
  0x60   : > { %v284_v16 = vrot.slane %v280_v13, %v1107_v6  ;;  %v288_v17 = vrot.slane %v280_v13, %v1110_v7  ;;  %v298_v18 = vrot.slane %v294_v14, %v1107_v6  ;;  %v302_v19 = vrot.slane %v294_v14, %v1110_v7  ;;  %s902_s21 = smov [#allocation8]  }
  0x61   : > { %v313_v20 = vmax.f32 %v311_v11, %v312_v15  ;;  %v319_v28 = vrot.slane %v318_v21, 4  ;;  %v1156_v32 = vsub.s32 %v393_v22, %v1095_v3  ;;  %p779_p7 = pnand %p778_p8, %p1320_p0  ;;  %s781_s8 = sshll.u32 %s902_s21, 4  ;;  %s782_s8 = int_to_ptr.vmem [resolvable:$false] %s781_s8 }
  0x62   : > { %vm1126_vm4 = vcmp.ne.s32.totalorder %v284_v16, 0  ;;  %vm1130_vm5 = vcmp.ne.s32.totalorder %v288_v17, 0  ;;  %vm1134_vm6 = vcmp.ne.s32.totalorder %v298_v18, 0  ;;  %vm1138_vm7 = vcmp.ne.s32.totalorder %v302_v19, 0  ;;  %s783_s10 = scalar_lea.vmem %s782_s8, 64  ;;  %p784_p10 = scmp.lt.s32.totalorder %s1179_s4, %s782_s8 }
  0x63   : > { %vm305_vm8 = vmand %vm1126_vm4, %vm1134_vm6  ;;  %v314_v27 = vrot.slane %v313_v20, 2  ;;  %v320_v31 = vmax.f32 %v318_v21, %v319_v28  ;;  %p780_p4 = pneg %p779_p7  ;;  %p785_p12 = scmp.lt.s32.totalorder %s783_s10, %s777_s19 }
  0x64   : > { %vm306_vm9 = vmand %vm1130_vm5, %vm1138_vm7  ;;  %v413_v29 = vsel %vm305_vm8, 1.0, %v899_v2  ;;  %v412_v39 = vld [vmem:[%s1097_s6] sm:$0x3] }
  0x65   : > { %v315_v30 = vmax.f32 %v313_v20, %v314_v27  ;;  %v414_v33 = vsel %vm306_vm9, 1.0, %v899_v2  ;;  %v321_v35 = vrot.slane %v320_v31, 2  ;;  %p786_p1 = por %p785_p12, %p784_p10 }
  0x66   : > { %v417_v36 = vcombine.low %v413_v29, %v414_v33 }
  0x67   : > { %v316_v34 = vrot.slane %v315_v30, 1  ;;  %v322_v37 = vmax.f32 %v320_v31, %v321_v35  ;;  %p787_p2 = pnand %p786_p1, %p780_p4 }
  0x68   : > { %v424_v38 = vrot.slane %v417_v36, %v1156_v32 }
  0x69   : > { %v1167_v40 = vmax.f32 %v315_v30, %v316_v34  ;;  %v323_v41 = vrot.slane %v322_v37, 1 }
  0x6a   : > { %v431_v42 = vrot.slane %v424_v38, %v1156_v32 }
  0x6b   : > { %v1170_v43 = vmax.f32 %v322_v37, %v323_v41 }
  0x6c   : > { %v433_v44 = vadd.f32 %v431_v42, %v412_v39 }
  0x6d   : > { %v327_v45 = vcombine.low %v1167_v40, %v1170_v43 }
  0x6e   : > { %434 = vst.msk [vmem:[%s1097_s6] sm:$0x3] %vm1086_vm0, %v433_v44 }
  0x6f   : > { %790 = shalt.err (!%p787_p2)
}
  0x70   : > { %s791_s30 = scalar_lea.hbm %s1177_s28, 32  ;;  %s795_s22 = scalar_lea.hbm %s1297_s3, 64 }
  0x71   : > { %p792_p9 = scmp.ne.s32.totalorder %s1177_s28, %s791_s30  ;;  %p796_p6 = scmp.lt.u32.totalorder %s1177_s28, %s1297_s3 }
  0x72   : > { %p797_p13 = scmp.lt.u32.totalorder %s795_s22, %s791_s30  ;;  %p799_p8 = scmp.lt.u32.totalorder %s791_s30, %s1177_s28 }
  0x73   : > { %p793_p11 = pnand %p792_p9, %p1320_p0 }
  0x74   : > { %p798_p5 = por %p797_p13, %p796_p6 }
  0x75   : > { %p794_p3 = pneg %p793_p11 }
  0x76   : > { %p800_p7 = por %p799_p8, %p798_p5 }
  0x78   : > { %p801_p4 = pnand %p800_p7, %p794_p3 }
  0x7a   : > { %804 = shalt.err (!%p801_p4)
}
  0x7b   : > { %640 = dma.vmem_to_hbm [thread:$0]  (%p1320_p0), %s1179_s4, 32, %s1177_s28, %s441_s11   ;;  %v329_v46 = vsub.f32 %v1102_v4, %v327_v45  ;;  %v360_v48 = vrot.slane %v1104_v5, %v1107_v6  ;;  %v364_v49 = vrot.slane %v1104_v5, %v1110_v7  ;;  %v383_v36 = vld [vmem:[%s1090_s29] sm:$0x3] }
  0x7c   : > { %s455_s4 = sshll.u32 %s1090_s29, 4  ;;  %s1242_s11 = scalar_lea.hbm %s1296_s2, %s633_s24  ;;  %s1244_s4 = int_to_ptr.vmem [resolvable:$true] %s455_s4 }
  0x7d   : > { %v330_v47 = vmul.f32 1.442695, %v329_v46  ;;  %vm365_vm10 = vcmp.eq.s32.totalorder %v1095_v3, %v360_v48  ;;  %vm366_vm11 = vcmp.eq.s32.totalorder %v1095_v3, %v364_v49  ;;  %s436_s19 = scalar_lea.sflag [#allocation4], %s1072_s23  ;;  %s805_s21 = scalar_lea.vmem %s1244_s4, 32 }
  0x7e   : > { %v367_v50 = vsel %vm365_vm10, %v1102_v4, 0.0  ;;  %v368_v54 = vsel %vm366_vm11, %v1116_v10, 0.0  ;;  %p806_p10 = scmp.ne.s32.totalorder %s1244_s4, %s805_s21  ;;  %s903_s15 = smov [#allocation7]  }
  0x7f   : > { %711 = vpow2.f32 %v330_v47  ;;  %v369_v56 = vsel %vm310_vm1, %v367_v50, 0.0  ;;  %v376_v60 = vsel %vm310_vm1, %v368_v54, 0.0  ;;  %s809_s8 = sshll.u32 %s903_s15, 4  ;;  %s810_s8 = int_to_ptr.vmem [resolvable:$false] %s809_s8 }
  0x80   : > { %v370_v61 = vrot.slane %v369_v56, 4  ;;  %v377_v0 = vrot.slane %v376_v60, 4  ;;  %p807_p12 = pnand %p806_p10, %p1320_p0  ;;  %s811_s10 = scalar_lea.vmem %s810_s8, 64 }
  0x81   : > { %p812_p2 = scmp.lt.s32.totalorder %s1244_s4, %s810_s8  ;;  %p813_p9 = scmp.lt.s32.totalorder %s811_s10, %s805_s21 }
  0x82   : > { %v371_v4 = vadd.f32 %v370_v61, %v369_v56  ;;  %v378_v7 = vadd.f32 %v377_v0, %v376_v60  ;;  %p808_p1 = pneg %p807_p12 }
  0x83   : > { %p814_p11 = por %p813_p9, %p812_p2 }
  0x84   : > { %v372_v10 = vrot.slane %v371_v4, 2  ;;  %v379_v12 = vrot.slane %v378_v7, 2 }
  0x85   : > { %p815_p3 = pnand %p814_p11, %p808_p1 }
  0x86   : > { %v373_v13 = vadd.f32 %v372_v10, %v371_v4  ;;  %v380_v14 = vadd.f32 %v379_v12, %v378_v7 }
  0x88   : > { %v374_v15 = vrot.slane %v373_v13, 1  ;;  %v381_v16 = vrot.slane %v380_v14, 1 }
  0x89   : > { %v712_v51 = vpop.eup %711 }
  0x8a   : > { %v333_v52 = vcombine.high %v712_v51, %v712_v51  ;;  %v335_v53 = vsel %vm310_vm1, %v712_v51, 0.0  ;;  %v375_v19 = vadd.f32 %v374_v15, %v373_v13  ;;  %v382_v27 = vadd.f32 %v381_v16, %v380_v14 }
  0x8b   : > { %v336_v55 = vrot.slane %v335_v53, 4 }
  0x8c   : > { %v342_v57 = vsel %vm310_vm1, %v333_v52, 0.0 }
  0x8d   : > { %v337_v58 = vadd.f32 %v336_v55, %v335_v53  ;;  %v343_v59 = vrot.slane %v342_v57, 4 }
  0x8f   : > { %v338_v62 = vrot.slane %v337_v58, 2  ;;  %v344_v63 = vadd.f32 %v343_v59, %v342_v57 }
  0x91   : > { %v339_v2 = vadd.f32 %v338_v62, %v337_v58  ;;  %v345_v3 = vrot.slane %v344_v63, 2 }
  0x93   : > { %v340_v5 = vrot.slane %v339_v2, 1  ;;  %v346_v6 = vadd.f32 %v345_v3, %v344_v63 }
  0x95   : > { %v341_v8 = vadd.f32 %v340_v5, %v339_v2  ;;  %v347_v9 = vrot.slane %v346_v6, 1 }
  0x97   : > { %v348_v11 = vadd.f32 %v347_v9, %v346_v6  ;;  %713 = vlog2.f32 %v341_v8 }
  0x99   : > { %715 = vlog2.f32 %v348_v11 }
  0xa1   : > { %v714_v17 = vpop.eup %713 }
  0xa2   : > { %v350_v18 = vmul.f32 0.6931472, %v714_v17 }
  0xa3   : > { %v716_v20 = vpop.eup %715 }
  0xa4   : > { %v352_v21 = vmul.f32 0.6931472, %v716_v20  ;;  %v353_v22 = vadd.f32 %v350_v18, %v1167_v40 }
  0xa6   : > { %v354_v28 = vadd.f32 %v352_v21, %v1170_v43  ;;  %v384_v29 = vsub.f32 %v353_v22, %v375_v19 }
  0xa8   : > { %v385_v30 = vsub.f32 %v354_v28, %v382_v27  ;;  %v386_v31 = vsel %vm305_vm8, %v384_v29, 0.0 }
  0xaa   : > { %v387_v33 = vsel %vm306_vm9, %v385_v30, 0.0 }
  0xab   : > { %v390_v34 = vcombine.low %v386_v31, %v387_v33 }
  0xad   : > { %v397_v35 = vrot.slane %v390_v34, %v1156_v32 }
  0xaf   : > { %v404_v37 = vrot.slane %v397_v35, %v1156_v32 }
  0xb1   : > { %v406_v38 = vadd.f32 %v404_v37, %v383_v36 }
  0xb3   : > { %411 = vst.msk [vmem:[%s1090_s29] sm:$0x3] %vm1086_vm0, %v406_v38 }
  0xb4   : > { %818 = shalt.err (!%p815_p3)
}
  0xb5   : > { %s819_s23 = scalar_lea.hbm %s1242_s11, 32  ;;  %s823_s30 = scalar_lea.hbm %s1296_s2, 64 }
  0xb6   : > { %p820_p6 = scmp.ne.s32.totalorder %s1242_s11, %s819_s23  ;;  %p824_p8 = scmp.lt.u32.totalorder %s1242_s11, %s1296_s2 }
  0xb7   : > { %p825_p7 = scmp.lt.u32.totalorder %s823_s30, %s819_s23  ;;  %p827_p10 = scmp.lt.u32.totalorder %s819_s23, %s1242_s11 }
  0xb8   : > { %p821_p13 = pnand %p820_p6, %p1320_p0 }
  0xb9   : > { %p826_p4 = por %p825_p7, %p824_p8 }
  0xba   : > { %p822_p5 = pneg %p821_p13 }
  0xbb   : > { %p828_p12 = por %p827_p10, %p826_p4 }
  0xbd   : > { %p829_p1 = pnand %p828_p12, %p822_p5 }
  0xbf   : > { %832 = shalt.err (!%p829_p1)
}
  0xc0   : > { %639 = dma.vmem_to_hbm [thread:$0]  (%p1320_p0), %s1244_s4, 32, %s1242_s11, %s436_s19  }
  0xc1 PF: > { %s481_s22 = sand.u32 1, %s875_s12   ;;  %p1321_p2 = scmp.ne.s32.totalorder %s1303_s27, 0 }
  0xc2   : > { %p1322_p9 = scmp.ge.s32.totalorder %s895_s17, 2  ;;  %s482_s6 = scalar_lea.sflag [#allocation4], %s481_s22 }
  0xc4   : > { %p651_p11 = pnand %p1322_p9, %p1321_p2 }
  0xc6   : > { %866 = dma.done.wait (!%p651_p11), %s482_s6, 32  }
  0xc7   : > { %868 = vsyncadd (!%p651_p11), %s482_s6, 4294967264  ;;  %s491_s5 = scalar_lea.sflag [#allocation9], %s481_s22 }
  0xc8   : > { %870 = dma.done.wait (!%p651_p11), %s491_s5, 32  }
  0xc9   : > { %872 = vsyncadd (!%p651_p11), %s491_s5, 4294967264  ;;  %s26_s17 = sadd.s32 1, %s895_s17   ;;  %s1323_s12 = smov %s879_s13 }
  0xca   : > { %p23_p3 = scmp.ge.s32.totalorder %s26_s17, 4   ;;  %s1324_s13 = smov %s883_s14 }
  0xcb   : > { %s1325_s14 = smov %s980_s26  ;;  %s1326_s15 = smov %s891_s16 }
  0xcc   : > { %s1327_s16 = smov %s1329_s20  ;;  %25 = sbr.rel (!%p23_p3) target bundleno = 10 (0xa), region = 107 }
  0xd3   :  { %496 = vsyncpa [#allocation3], 1 }
  0xd4   :  { %498 = vsyncpa [#allocation3 + $0x1], 1 }
  0xd5   :  { %499 = vsyncpa [#allocation6], 1 }
  0xd6   :  { %501 = vsyncpa [#allocation6 + $0x1], 1 }
  0xd7   :  { %502 = vsyncpa [#allocation4], 1 }
  0xd8   :  { %504 = vsyncpa [#allocation4 + $0x1], 1 }
  0xd9   :  { %505 = vsyncpa [#allocation9], 1 }
  0xda   :  { %507 = vsyncpa [#allocation9 + $0x1], 1 }

</bundles_post_ra>
